<compile_context>
chip_gen: v7x
topology: tpu7x:2x2x1
jax: 0.10.0
libtpu: 0.0.40
codegen_flags: <defaults>
</compile_context>

<pallas_src>
import functools

import jax
import jax.numpy as jnp
from jax.experimental import pallas as pl
from jax.experimental.pallas import tpu as pltpu


# ----------------------------------------------------------------------------
# Kernels
# ----------------------------------------------------------------------------
def _reparam_cols_kernel(mu_ref, logvar_ref, noise_ref, z_ref):
    """z = eps * exp(0.5 * (logvar + 1e-9)) + mu, mu/logvar pre-split via BlockSpecs."""
    mu = mu_ref[...].astype(jnp.float32)
    logvar = logvar_ref[...].astype(jnp.float32) + jnp.float32(1e-9)
    std = jnp.exp(jnp.float32(0.5) * logvar)                  # EUP
    z = noise_ref[...].astype(jnp.float32) * std + mu         # VPU
    z_ref[...] = z.astype(z_ref.dtype)


def _reparam_split_kernel(logits_ref, noise_ref, z_ref):
    """Same math, but splits the logits block into mu/logvar halves in-kernel."""
    out_size = z_ref.shape[-1]
    x = logits_ref[...].astype(jnp.float32)
    mu = x[:, :out_size]
    logvar = x[:, out_size:] + jnp.float32(1e-9)
    std = jnp.exp(jnp.float32(0.5) * logvar)
    z = noise_ref[...].astype(jnp.float32) * std + mu
    z_ref[...] = z.astype(z_ref.dtype)


# ----------------------------------------------------------------------------
# Wrapper
# ----------------------------------------------------------------------------
def _pick_block_batch(batch, feat, itemsize, block_batch):
    """Rows of the batch processed per grid step."""
    if block_batch is not None:
        return min(block_batch, batch)
    # ~1 MiB of logits per block per stream -> >=85% of HBM roofline territory.
    target_bytes = 1 << 20
    tb = max(8, (target_bytes // (feat * itemsize)) // 8 * 8)
    if batch <= tb:
        if batch > 16:
            # v7x megacore: prefer >=2 grid blocks so ("parallel",) shards
            # the work over both TensorCores of a chip.
            tb = max(8, ((-(-batch // 2)) + 7) // 8 * 8)
        else:
            tb = batch                      # single whole-array block
    return tb


def isotropic_gaussian_forward(logits, noise=None, *, training=True,
                               rng_key=None, block_batch=None):
    """Pallas implementation of IsotropicGaussian.forward.

    Args:
      logits: [B, continuous_size] (continuous_size even), f32 or bf16.
      noise:  [B, continuous_size // 2] N(0,1) draws, or None to draw eps in
              the wrapper with jax.random (seeded by rng_key).
      training: if True use the reparameterization trick, else z = mu.
      block_batch: optional override for batch rows per grid step.

    Returns:
      (z, {'z': z, 'gaussian': {'z': z, 'mu': mu, 'logvar': logvar}})
    """
    batch, feat = logits.shape
    assert feat % 2 == 0, "continuous_size must be even"
    out_size = feat // 2

    # mu / logvar are pure slices of logits; let XLA fuse them into consumers.
    mu = logits[:, :out_size]
    logvar = logits[:, out_size:] + jnp.asarray(1e-9, logits.dtype)

    if not training:
        # Eval path: z = mu.  No kernel launch, no noise.
        gauss = {'z': mu, 'mu': mu, 'logvar': logvar}
        return mu, {'z': mu, 'gaussian': gauss}

    if noise is None:
        # TODO(synk): jax.random stream is not bit-identical to torch's .normal_().
        if rng_key is None:
            rng_key = jax.random.PRNGKey(0)
        noise = jax.random.normal(rng_key, (batch, out_size), dtype=logits.dtype)
    assert noise.shape == (batch, out_size)

    itemsize = jnp.dtype(logits.dtype).itemsize
    tb = _pick_block_batch(batch, feat, itemsize, block_batch)
    num_blocks = pl.cdiv(batch, tb)

    cparams = pltpu.CompilerParams(dimension_semantics=("parallel",))
    n = batch * out_size
    cost = pl.CostEstimate(flops=3 * n, transcendentals=n,
                           bytes_accessed=itemsize * (batch * feat + 2 * n))

    out_sds = jax.ShapeDtypeStruct((batch, out_size), logits.dtype)
    half_block = pl.BlockSpec((tb, out_size), lambda i: (i, 0))

    if out_size % 128 == 0:
        # Lane-aligned halves: feed logits twice with column-offset BlockSpecs.
        mu_spec = pl.BlockSpec((tb, out_size), lambda i: (i, 0))
        lv_spec = pl.BlockSpec((tb, out_size), lambda i: (i, 1))
        z = pl.pallas_call(
            _reparam_cols_kernel,
            out_shape=out_sds,
            grid=(num_blocks,),
            in_specs=[mu_spec, lv_spec, half_block],
            out_specs=half_block,
            compiler_params=cparams,
            cost_estimate=cost,
        )(logits, logits, noise)
    else:
        # Unaligned halves: one full-width logits block, split in-kernel (XLU).
        logits_spec = pl.BlockSpec((tb, feat), lambda i: (i, 0))
        z = pl.pallas_call(
            _reparam_split_kernel,
            out_shape=out_sds,
            grid=(num_blocks,),
            in_specs=[logits_spec, half_block],
            out_specs=half_block,
            compiler_params=cparams,
            cost_estimate=cost,
        )(logits, noise)

    gauss = {'z': z, 'mu': mu, 'logvar': logvar}
    return z, {'z': z, 'gaussian': gauss}


# ----------------------------------------------------------------------------
# Pure-JAX reference (mirrors the PyTorch module's forward)
# ----------------------------------------------------------------------------
def _reference_forward(logits, noise, training=True):
    out_size = logits.shape[-1] // 2
    mu = logits[:, :out_size]
    logvar = logits[:, out_size:] + 1e-9
    if training:
        std = jnp.exp(0.5 * logvar)
        z = noise * std + mu
    else:
        z = mu
    return z, mu, logvar


if __name__ == "__main__":
    # config = {'continuous_size': 64}  -> input_size=64, output_size=32
    batch = 8
    continuous_size = 64
    out_size = continuous_size // 2

    key = jax.random.PRNGKey(0)
    k_logits, k_noise, k_eps, k_a, k_b, k_c, k_d = jax.random.split(key, 7)
    logits = jax.random.normal(k_logits, (batch, continuous_size), dtype=jnp.float32)
    # Deterministic N(0,1) draw standing in for torch's .normal_() eps.
    noise = jax.random.normal(k_noise, (batch, out_size), dtype=jnp.float32)

    # --- training path, small shape (single whole-array block) --------------
    z, params = isotropic_gaussian_forward(logits, noise, training=True)
    jax.block_until_ready(z)
    z_ref, mu_ref, logvar_ref = _reference_forward(logits, noise, training=True)
    assert z.shape == (batch, out_size)
    assert jnp.allclose(z, z_ref, atol=1e-5, rtol=1e-5)
    assert jnp.allclose(params['gaussian']['mu'], mu_ref, atol=1e-6)
    assert jnp.allclose(params['gaussian']['logvar'], logvar_ref, atol=1e-6)

    # --- eval path: pure slice, no kernel launch -----------------------------
    z_eval, _ = isotropic_gaussian_forward(logits, training=False)
    jax.block_until_ready(z_eval)
    assert jnp.allclose(z_eval, mu_ref, atol=1e-6)

    # --- gridded path, out_size NOT a multiple of 128 (in-kernel split) ------
    b2, f2 = 1024, 160                                     # out_size=80, 4 blocks of 256
    lg2 = jax.random.normal(k_a, (b2, f2), dtype=jnp.float32)
    ns2 = jax.random.normal(k_b, (b2, f2 // 2), dtype=jnp.float32)
    z2, _ = isotropic_gaussian_forward(lg2, ns2, training=True, block_batch=256)
    jax.block_until_ready(z2)
    z2_ref, _, _ = _reference_forward(lg2, ns2, training=True)
    assert jnp.allclose(z2, z2_ref, atol=1e-5, rtol=1e-5)

    # --- gridded path, out_size multiple of 128 (column-offset BlockSpecs) ---
    b3, f3 = 512, 512                                      # out_size=256, 4 blocks of 128
    lg3 = jax.random.normal(k_c, (b3, f3), dtype=jnp.float32)
    ns3 = jax.random.normal(k_d, (b3, f3 // 2), dtype=jnp.float32)
    z3, _ = isotropic_gaussian_forward(lg3, ns3, training=True, block_batch=128)
    jax.block_until_ready(z3)
    z3_ref, _, _ = _reference_forward(lg3, ns3, training=True)
    assert jnp.allclose(z3, z3_ref, atol=1e-5, rtol=1e-5)

    # --- noise=None path (eps drawn in wrapper; sanity-checked only) ---------
    z_rng, _ = isotropic_gaussian_forward(logits, noise=None, training=True,
                                          rng_key=k_eps)
    jax.block_until_ready(z_rng)
    assert z_rng.shape == (batch, out_size)
    assert bool(jnp.all(jnp.isfinite(z_rng)))

    print("KERNEL_OK")
</pallas_src>

<mosaic_0001>
module attributes {stable_mosaic.version = 11 : i64} {
  func.func @_reparam_split_kernel(%arg0: i32, %arg1: memref<8x64xf32, #tpu.memory_space<vmem>>, %arg2: memref<8x32xf32, #tpu.memory_space<vmem>>, %arg3: memref<8x32xf32, #tpu.memory_space<vmem>>) attributes {dimension_semantics = [#tpu.dimension_semantics<parallel>], iteration_bounds = array<i64: 1>, scalar_prefetch = 0 : i64, scratch_operands = 0 : i64, tpu.core_type = #tpu.core_type<tc>, window_params = [{transform_indices = @transform_0, window_bounds = array<i64: 8, 64>}, {transform_indices = @transform_1, window_bounds = array<i64: 8, 32>}, {transform_indices = @transform_2, window_bounds = array<i64: 8, 32>}]} {
    %c0 = arith.constant 0 : index
    %c0_0 = arith.constant 0 : index
    %0 = vector.load %arg1[%c0, %c0_0] : memref<8x64xf32, #tpu.memory_space<vmem>>, vector<8x64xf32>
    %1 = vector.extract_strided_slice %0 {offsets = [0, 0], sizes = [8, 32], strides = [1, 1]} : vector<8x64xf32> to vector<8x32xf32>
    %2 = vector.extract_strided_slice %0 {offsets = [0, 32], sizes = [8, 32], strides = [1, 1]} : vector<8x64xf32> to vector<8x32xf32>
    %cst = arith.constant 9.99999971E-10 : f32
    %3 = vector.broadcast %cst : f32 to vector<8x32xf32>
    %4 = arith.addf %2, %3 : vector<8x32xf32>
    %cst_1 = arith.constant 5.000000e-01 : f32
    %5 = vector.broadcast %cst_1 : f32 to vector<8x32xf32>
    %6 = arith.mulf %5, %4 : vector<8x32xf32>
    %7 = math.exp %6 : vector<8x32xf32>
    %c0_2 = arith.constant 0 : index
    %c0_3 = arith.constant 0 : index
    %8 = vector.load %arg2[%c0_2, %c0_3] : memref<8x32xf32, #tpu.memory_space<vmem>>, vector<8x32xf32>
    %9 = arith.mulf %8, %7 : vector<8x32xf32>
    %10 = arith.addf %9, %1 : vector<8x32xf32>
    %c0_4 = arith.constant 0 : index
    %c0_5 = arith.constant 0 : index
    %11 = vector.load %arg3[%c0_4, %c0_5] : memref<8x32xf32, #tpu.memory_space<vmem>>, vector<8x32xf32>
    tpu.vector_store %arg3[%c0_4, %c0_5], %10 {strides = array<i32>} : memref<8x32xf32, #tpu.memory_space<vmem>>, vector<8x32xf32>,
    return
  }
  func.func @transform_0(%arg0: i32) -> (i32, i32) {
    %c0_i32 = arith.constant 0 : i32
    %c0_i32_0 = arith.constant 0 : i32
    return %arg0, %c0_i32 : i32, i32
  }
  func.func @transform_1(%arg0: i32) -> (i32, i32) {
    %c0_i32 = arith.constant 0 : i32
    %c0_i32_0 = arith.constant 0 : i32
    return %arg0, %c0_i32 : i32, i32
  }
  func.func @transform_2(%arg0: i32) -> (i32, i32) {
    %c0_i32 = arith.constant 0 : i32
    %c0_i32_0 = arith.constant 0 : i32
    return %arg0, %c0_i32 : i32, i32
  }
}

</mosaic_0001>

<bundles_post_ra>
// kernel: tpu_custom_call.1
= control target key start
LH: loop header
LB: loop body
LE: loop exit
PB: predicated region body
PF: predicated region fallthrough
CT: control target
= control target key end

     0   :  { %7 = vsyncpa [#allocation3], 0  ;;  %s199_s0 = inlined_call_operand.hbm [shape: f32[8,64], index: 0, kind: input, shape index: {}]   ;;  %s200_s1 = inlined_call_operand.hbm [shape: f32[8,32], index: 1, kind: input, shape index: {}]   ;;  %s201_s2 = inlined_call_operand.hbm [shape: f32[8,32], index: 2, kind: output, shape index: {}]  }
   0x1   :  { %8 = vsyncpa [#allocation6], 0 }
   0x2   :  { %9 = vsyncpa [#allocation4], 0  ;;  %s144_s9 = smov [#allocation2]   ;;  %s145_s11 = smov [#allocation5]  }
   0x3   :  { %s16_s10 = sshll.u32 %s144_s9, 4  ;;  %s26_s12 = sshll.u32 %s145_s11, 4  ;;  %s17_s10 = int_to_ptr.vmem [resolvable:$true] %s16_s10  ;;  %s27_s12 = int_to_ptr.vmem [resolvable:$true] %s26_s12 }
   0x4   :  { %s72_s15 = scalar_lea.hbm %s199_s0, 128 }
   0x5   :  { %p73_p0 = scmp.ne.s32.totalorder %s199_s0, %s72_s15  ;;  %p76_p1 = scmp.lt.u32.totalorder %s72_s15, %s199_s0 }
   0x7   :  { %p78_p2 = pnand %p76_p1, %p73_p0 }
   0x9   :  { %81 = shalt.err (!%p78_p2)
}
   0xa   :  { %s82_s20 = scalar_lea.vmem %s17_s10, 128  ;;  %p87_p4 = scmp.lt.s32.totalorder %s17_s10, %s17_s10 }
   0xb   :  { %p83_p3 = scmp.ne.s32.totalorder %s17_s10, %s82_s20  ;;  %p88_p5 = scmp.lt.s32.totalorder %s82_s20, %s82_s20 }
   0xd   :  { %p89_p6 = por %p88_p5, %p87_p4 }
   0xf   :  { %p90_p7 = pnand %p89_p6, %p83_p3 }
  0x11   :  { %93 = shalt.err (!%p90_p7)
}
  0x12   :  { %19 = dma.hbm_to_vmem [thread:$0]  %s199_s0, 128, %s17_s10, [#allocation3]  }
  0x13   :  { %s94_s25 = scalar_lea.hbm %s200_s1, 128 }
  0x14   :  { %p95_p8 = scmp.ne.s32.totalorder %s200_s1, %s94_s25  ;;  %p98_p9 = scmp.lt.u32.totalorder %s94_s25, %s200_s1 }
  0x16   :  { %p100_p10 = pnand %p98_p9, %p95_p8 }
  0x18   :  { %103 = shalt.err (!%p100_p10)
}
  0x19   :  { %s104_s30 = scalar_lea.vmem %s27_s12, 128  ;;  %p109_p12 = scmp.lt.s32.totalorder %s27_s12, %s27_s12 }
  0x1a   :  { %p105_p11 = scmp.ne.s32.totalorder %s27_s12, %s104_s30  ;;  %p110_p13 = scmp.lt.s32.totalorder %s104_s30, %s104_s30 }
  0x1c   :  { %p111_p0 = por %p110_p13, %p109_p12 }
  0x1e   :  { %p112_p1 = pnand %p111_p0, %p105_p11 }
  0x20   :  { %115 = shalt.err (!%p112_p1)
}
  0x21   :  { %29 = dma.hbm_to_vmem [thread:$0]  %s200_s1, 128, %s27_s12, [#allocation6]  }
  0x22   :  { %138 = dma.done.wait [#allocation3], 128  }
  0x23   :  { %139 = vsyncadd [#allocation3], 4294967168 }
  0x24   :  { %140 = dma.done.wait [#allocation6], 128  }
  0x25   :  { %141 = vsyncadd [#allocation6], 4294967168  ;;  %v36_v0 = vld [vmem:[#allocation2] sm:$0xff]  ;;  %s146_s4 = smov 96   ;;  %v41_v5 = vld [vmem:[#allocation5] sm:$0xff]  ;;  %s147_s5 = smov [#allocation7]  }
  0x26   :  { %v37_v1 = vadd.f32 1e-09, %v36_v0  ;;  %s56_s6 = sshll.u32 %s147_s5, 4  ;;  %vm48_vm0 = vcmask 261120   ;;  %s57_s6 = int_to_ptr.vmem [resolvable:$true] %s56_s6 }
  0x27   :  { %s116_s1 = scalar_lea.vmem %s57_s6, 128  ;;  %p121_p3 = scmp.lt.s32.totalorder %s57_s6, %s57_s6 }
  0x28   :  { %v38_v2 = vmul.f32 0.5, %v37_v1  ;;  %p117_p2 = scmp.ne.s32.totalorder %s57_s6, %s116_s1  ;;  %p122_p4 = scmp.lt.s32.totalorder %s116_s1, %s116_s1 }
  0x2a   :  { %v39_v3 = vmul.f32 1.442695, %v38_v2  ;;  %p123_p5 = por %p122_p4, %p121_p3 }
  0x2c   :  { %70 = vpow2.f32 %v39_v3  ;;  %p124_p6 = pnand %p123_p5, %p117_p2 }
  0x36   :  { %v71_v4 = vpop.eup %70 }
  0x37   :  { %43 = vrot.lane.b32.xlu0 %v71_v4, %s146_s4 }
  0xa9   :  { %v44_v6 = vpop.permute.xlu0 %43 }
  0xaa   :  { %v46_v7 = vmul.f32 %v44_v6, %v41_v5 }
  0xac   :  { %v47_v8 = vadd.f32 %v46_v7, %v36_v0 }
  0xae   :  { %49 = vst.msk [vmem:[#allocation7] sm:$0xff] %vm48_vm0, %v47_v8 }
  0xaf   :  { %127 = shalt.err (!%p124_p6)
}
  0xb0   :  { %s128_s9 = scalar_lea.hbm %s201_s2, 128 }
  0xb1   :  { %p129_p7 = scmp.ne.s32.totalorder %s201_s2, %s128_s9  ;;  %p132_p8 = scmp.lt.u32.totalorder %s128_s9, %s201_s2 }
  0xb3   :  { %p134_p9 = pnand %p132_p8, %p129_p7 }
  0xb5   :  { %137 = shalt.err (!%p134_p9)
}
  0xb6   :  { %59 = dma.vmem_to_hbm [thread:$0]  %s57_s6, 128, %s201_s2, [#allocation4]  }
  0xb7   :  { %142 = dma.done.wait [#allocation4], 128  }
  0xb8   :  { %143 = vsyncadd [#allocation4], 4294967168 }
  0xb9   :  { %63 = vsyncpa [#allocation3], 1 }
  0xba   :  { %64 = vsyncpa [#allocation6], 1 }
  0xbb   :  { %65 = vsyncpa [#allocation4], 1 }

</bundles_post_ra>
